<compile_context>
chip_gen: v5e
topology: v5e:2x2
jax: 0.10.0
libtpu: 0.0.40
codegen_flags: <defaults>
</compile_context>

<pallas_src>
from functools import partial

import jax
import jax.numpy as jnp
from jax.experimental import pallas as pl
from jax.experimental.pallas import tpu as pltpu

LN_EPS = 1e-5  # PyTorch nn.LayerNorm default


def _round_up(x, m):
    return ((x + m - 1) // m) * m


def _pad2(x, shape):
    """Zero-pad a 2-D array up to `shape`."""
    return jnp.pad(x, ((0, shape[0] - x.shape[0]), (0, shape[1] - x.shape[1])))


def _masked_layernorm(x, gamma, beta, true_n):
    """LayerNorm over the last dim where only the first `true_n` lanes are
    meaningful. Padded lanes of `x` must be exactly zero (guaranteed by the
    zero-padded weights/biases), so plain sums divided by `true_n` give the
    correct mean / E[x^2]. Two independent reductions keep the XLU busy."""
    inv_n = 1.0 / true_n
    mu = jnp.sum(x, axis=-1, keepdims=True) * inv_n
    ex2 = jnp.sum(x * x, axis=-1, keepdims=True) * inv_n
    var = jnp.maximum(ex2 - mu * mu, 0.0)
    return (x - mu) * jax.lax.rsqrt(var + LN_EPS) * gamma + beta


def critic_kernel(fc1_n, fc2_n, n_actions,
                  state_ref, action_ref, w1_ref, w2_ref, wa_ref,
                  p1_ref, p2_ref, out_ref):
    # packed params: p1 = [b1; g1; be1] (3, F1), p2 = [b2; g2; be2; ba] (4, F2)
    p1 = p1_ref[...]
    p2 = p2_ref[...]

    # ---- action branch (independent of state branch): VPU broadcast FMAs ----
    act = action_ref[...]                      # (TB, n_actions) f32
    wa = wa_ref[...]                           # (n_actions, F2) f32
    a = jnp.broadcast_to(p2[3:4, :], (act.shape[0], wa.shape[1]))
    for k in range(n_actions):                 # static, tiny unrolled loop
        a = a + act[:, k:k + 1] * wa[k:k + 1, :]

    # ---- state branch: fc1 -> LayerNorm -> relu ----
    h = jnp.dot(state_ref[...], w1_ref[...],   # bf16 x bf16 -> f32 on the MXU
                preferred_element_type=jnp.float32)
    h = h + p1[0:1, :]
    h = _masked_layernorm(h, p1[1:2, :], p1[2:3, :], fc1_n)
    h = jnp.maximum(h, 0.0)

    # ---- fc2 -> LayerNorm -> relu ----
    h = jnp.dot(h.astype(jnp.bfloat16), w2_ref[...],
                preferred_element_type=jnp.float32)
    h = h + p2[0:1, :]
    h = _masked_layernorm(h, p2[1:2, :], p2[2:3, :], fc2_n)
    h = jnp.maximum(h, 0.0)

    # ---- relu(state_branch + action_branch) ----
    out_ref[...] = jnp.maximum(h + a, 0.0)


def prepare_params(p, input_dims, fc1_dims, fc2_dims, n_actions):
    """Pad feature dims to 128-lane multiples, pack per-layer vectors, and cast
    MXU weights to bf16. Done once per parameter update, not per forward."""
    in_pad = _round_up(input_dims, 128)
    f1_pad = _round_up(fc1_dims, 128)
    f2_pad = _round_up(fc2_dims, 128)

    w1 = _pad2(p["w1"], (in_pad, f1_pad)).astype(jnp.bfloat16)
    w2 = _pad2(p["w2"], (f1_pad, f2_pad)).astype(jnp.bfloat16)
    wa = _pad2(p["wa"], (n_actions, f2_pad)).astype(jnp.float32)  # VPU path: keep f32

    p1 = jnp.concatenate([_pad2(p["b1"], (1, f1_pad)),
                          _pad2(p["g1"], (1, f1_pad)),
                          _pad2(p["be1"], (1, f1_pad))], axis=0).astype(jnp.float32)
    p2 = jnp.concatenate([_pad2(p["b2"], (1, f2_pad)),
                          _pad2(p["g2"], (1, f2_pad)),
                          _pad2(p["be2"], (1, f2_pad)),
                          _pad2(p["ba"], (1, f2_pad))], axis=0).astype(jnp.float32)

    return dict(w1=w1, w2=w2, wa=wa, p1=p1, p2=p2,
                dims=(input_dims, fc1_dims, fc2_dims, n_actions,
                      in_pad, f1_pad, f2_pad))


def critic_forward(state, action, prep, *, batch_tile=256):
    """state: [B, input_dims] f32, action: [B, n_actions] f32 -> [B, fc2_dims] f32."""
    (input_dims, fc1_dims, fc2_dims, n_actions,
     in_pad, f1_pad, f2_pad) = prep["dims"]
    B = state.shape[0]

    # batch tile: multiple of 8, big enough to feed the MXU when B is large
    TB = batch_tile if B >= batch_tile else _round_up(B, 8)
    B_pad = _round_up(B, TB)

    state_p = _pad2(state, (B_pad, in_pad)).astype(jnp.bfloat16)
    action_p = _pad2(action, (B_pad, n_actions)).astype(jnp.float32)

    grid = (pl.cdiv(B_pad, TB),)
    kernel = partial(critic_kernel, float(fc1_dims), float(fc2_dims), int(n_actions))

    out = pl.pallas_call(
        kernel,
        out_shape=jax.ShapeDtypeStruct((B_pad, f2_pad), jnp.float32),
        grid=grid,
        in_specs=[
            pl.BlockSpec((TB, in_pad), lambda i: (i, 0)),        # state (batched)
            pl.BlockSpec((TB, n_actions), lambda i: (i, 0)),     # action (batched)
            pl.BlockSpec((in_pad, f1_pad), lambda i: (0, 0)),    # w1 (resident)
            pl.BlockSpec((f1_pad, f2_pad), lambda i: (0, 0)),    # w2 (resident)
            pl.BlockSpec((n_actions, f2_pad), lambda i: (0, 0)), # wa (resident)
            pl.BlockSpec((3, f1_pad), lambda i: (0, 0)),         # [b1;g1;be1]
            pl.BlockSpec((4, f2_pad), lambda i: (0, 0)),         # [b2;g2;be2;ba]
        ],
        out_specs=pl.BlockSpec((TB, f2_pad), lambda i: (i, 0)),
        compiler_params=pltpu.CompilerParams(
            dimension_semantics=("parallel",)),
    )(state_p, action_p, prep["w1"], prep["w2"], prep["wa"], prep["p1"], prep["p2"])

    return out[:B, :fc2_dims]


def init_params(key, input_dims, fc1_dims, fc2_dims, n_actions):
    """Deterministic init mirroring the module's uniform ranges.
    PyTorch uses f = 1/sqrt(weight.size()[0]) = 1/sqrt(out_features)."""
    ks = jax.random.split(key, 6)
    f1 = 1.0 / jnp.sqrt(fc1_dims)
    f2 = 1.0 / jnp.sqrt(fc2_dims)
    f4 = 1.0 / jnp.sqrt(fc2_dims)
    # weights stored as [in, out] (pre-transposed for x @ W)
    w1 = jax.random.uniform(ks[0], (input_dims, fc1_dims), jnp.float32, -f1, f1)
    b1 = jax.random.uniform(ks[1], (1, fc1_dims), jnp.float32, -f1, f1)
    w2 = jax.random.uniform(ks[2], (fc1_dims, fc2_dims), jnp.float32, -f2, f2)
    b2 = jax.random.uniform(ks[3], (1, fc2_dims), jnp.float32, -f2, f2)
    wa = jax.random.uniform(ks[4], (n_actions, fc2_dims), jnp.float32, -f4, f4)
    ba = jax.random.uniform(ks[5], (1, fc2_dims), jnp.float32, -f4, f4)
    # LayerNorm affine params: PyTorch default init (ones / zeros)
    g1 = jnp.ones((1, fc1_dims), jnp.float32)
    be1 = jnp.zeros((1, fc1_dims), jnp.float32)
    g2 = jnp.ones((1, fc2_dims), jnp.float32)
    be2 = jnp.zeros((1, fc2_dims), jnp.float32)
    return dict(w1=w1, b1=b1, g1=g1, be1=be1,
                w2=w2, b2=b2, g2=g2, be2=be2,
                wa=wa, ba=ba)


def _ln_ref(x, gamma, beta):
    mu = jnp.mean(x, axis=-1, keepdims=True)
    var = jnp.mean((x - mu) * (x - mu), axis=-1, keepdims=True)
    return (x - mu) * jax.lax.rsqrt(var + LN_EPS) * gamma + beta


def critic_ref(state, action, p):
    """Pure-JAX reference. Applies the same bf16 quantization to the matmul
    operands as the kernel does, so the comparison isolates kernel errors."""
    bf = lambda x: x.astype(jnp.bfloat16).astype(jnp.float32)
    h = bf(state) @ bf(p["w1"]) + p["b1"]
    h = _ln_ref(h, p["g1"], p["be1"])
    h = jnp.maximum(h, 0.0)
    h = bf(h) @ bf(p["w2"]) + p["b2"]
    h = _ln_ref(h, p["g2"], p["be2"])
    h = jnp.maximum(h, 0.0)
    a = action @ p["wa"] + p["ba"]
    return jnp.maximum(h + a, 0.0)


if __name__ == "__main__":
    # small shapes consistent with the module's forward
    B, input_dims, fc1_dims, fc2_dims, n_actions = 8, 32, 64, 32, 4

    key = jax.random.PRNGKey(0)
    k_state, k_action, k_params = jax.random.split(key, 3)
    state = jax.random.normal(k_state, (B, input_dims), jnp.float32)
    action = jax.random.normal(k_action, (B, n_actions), jnp.float32)
    params = init_params(k_params, input_dims, fc1_dims, fc2_dims, n_actions)

    prep = prepare_params(params, input_dims, fc1_dims, fc2_dims, n_actions)
    out = critic_forward(state, action, prep)
    out = jax.block_until_ready(out)

    ref = critic_ref(state, action, params)
    assert out.shape == (B, fc2_dims)
    assert jnp.allclose(out, ref, atol=1e-2, rtol=1e-2), \
        float(jnp.max(jnp.abs(out - ref)))

    # TODO(synk): the unused `q` head, optimizer, checkpointing and device
    # management from the PyTorch module are training/IO concerns, not part of
    # the forward pass, and are intentionally not implemented here.
    print("KERNEL_OK")
</pallas_src>

<mosaic_0001>
module attributes {stable_mosaic.version = 11 : i64} {
  func.func @critic_kernel(%arg0: i32, %arg1: memref<8x128xbf16, #tpu.memory_space<vmem>>, %arg2: memref<8x4xf32, #tpu.memory_space<vmem>>, %arg3: memref<128x128xbf16, #tpu.memory_space<vmem>>, %arg4: memref<128x128xbf16, #tpu.memory_space<vmem>>, %arg5: memref<4x128xf32, #tpu.memory_space<vmem>>, %arg6: memref<3x128xf32, #tpu.memory_space<vmem>>, %arg7: memref<4x128xf32, #tpu.memory_space<vmem>>, %arg8: memref<8x128xf32, #tpu.memory_space<vmem>>) attributes {dimension_semantics = [#tpu.dimension_semantics<parallel>], iteration_bounds = array<i64: 1>, scalar_prefetch = 0 : i64, scratch_operands = 0 : i64, tpu.core_type = #tpu.core_type<tc>, window_params = [{transform_indices = @transform_0, window_bounds = array<i64: 8, 128>}, {transform_indices = @transform_1, window_bounds = array<i64: 8, 4>}, {pipeline_mode = #tpu.pipeline_mode<synchronous>, transform_indices = @transform_2, window_bounds = array<i64: 128, 128>}, {pipeline_mode = #tpu.pipeline_mode<synchronous>, transform_indices = @transform_3, window_bounds = array<i64: 128, 128>}, {pipeline_mode = #tpu.pipeline_mode<synchronous>, transform_indices = @transform_4, window_bounds = array<i64: 4, 128>}, {pipeline_mode = #tpu.pipeline_mode<synchronous>, transform_indices = @transform_5, window_bounds = array<i64: 3, 128>}, {pipeline_mode = #tpu.pipeline_mode<synchronous>, transform_indices = @transform_6, window_bounds = array<i64: 4, 128>}, {transform_indices = @transform_7, window_bounds = array<i64: 8, 128>}]} {
    %c0 = arith.constant 0 : index
    %c0_0 = arith.constant 0 : index
    %0 = vector.load %arg6[%c0, %c0_0] : memref<3x128xf32, #tpu.memory_space<vmem>>, vector<3x128xf32>
    %c0_1 = arith.constant 0 : index
    %c0_2 = arith.constant 0 : index
    %1 = vector.load %arg7[%c0_1, %c0_2] : memref<4x128xf32, #tpu.memory_space<vmem>>, vector<4x128xf32>
    %c0_3 = arith.constant 0 : index
    %c0_4 = arith.constant 0 : index
    %2 = vector.load %arg2[%c0_3, %c0_4] : memref<8x4xf32, #tpu.memory_space<vmem>>, vector<8x4xf32>
    %c0_5 = arith.constant 0 : index
    %c0_6 = arith.constant 0 : index
    %3 = vector.load %arg5[%c0_5, %c0_6] : memref<4x128xf32, #tpu.memory_space<vmem>>, vector<4x128xf32>
    %4 = vector.extract_strided_slice %1 {offsets = [3, 0], sizes = [1, 128], strides = [1, 1]} : vector<4x128xf32> to vector<1x128xf32>
    %5 = vector.shape_cast %4 : vector<1x128xf32> to vector<1x128xf32>
    %6 = vector.broadcast %5 : vector<1x128xf32> to vector<8x128xf32>
    %7 = vector.extract_strided_slice %2 {offsets = [0, 0], sizes = [8, 1], strides = [1, 1]} : vector<8x4xf32> to vector<8x1xf32>
    %8 = vector.extract_strided_slice %3 {offsets = [0, 0], sizes = [1, 128], strides = [1, 1]} : vector<4x128xf32> to vector<1x128xf32>
    %9 = vector.broadcast %7 : vector<8x1xf32> to vector<8x128xf32>
    %10 = vector.broadcast %8 : vector<1x128xf32> to vector<8x128xf32>
    %11 = arith.mulf %9, %10 : vector<8x128xf32>
    %12 = arith.addf %6, %11 : vector<8x128xf32>
    %13 = vector.extract_strided_slice %2 {offsets = [0, 1], sizes = [8, 1], strides = [1, 1]} : vector<8x4xf32> to vector<8x1xf32>
    %14 = vector.extract_strided_slice %3 {offsets = [1, 0], sizes = [1, 128], strides = [1, 1]} : vector<4x128xf32> to vector<1x128xf32>
    %15 = vector.broadcast %13 : vector<8x1xf32> to vector<8x128xf32>
    %16 = vector.broadcast %14 : vector<1x128xf32> to vector<8x128xf32>
    %17 = arith.mulf %15, %16 : vector<8x128xf32>
    %18 = arith.addf %12, %17 : vector<8x128xf32>
    %19 = vector.extract_strided_slice %2 {offsets = [0, 2], sizes = [8, 1], strides = [1, 1]} : vector<8x4xf32> to vector<8x1xf32>
    %20 = vector.extract_strided_slice %3 {offsets = [2, 0], sizes = [1, 128], strides = [1, 1]} : vector<4x128xf32> to vector<1x128xf32>
    %21 = vector.broadcast %19 : vector<8x1xf32> to vector<8x128xf32>
    %22 = vector.broadcast %20 : vector<1x128xf32> to vector<8x128xf32>
    %23 = arith.mulf %21, %22 : vector<8x128xf32>
    %24 = arith.addf %18, %23 : vector<8x128xf32>
    %25 = vector.extract_strided_slice %2 {offsets = [0, 3], sizes = [8, 1], strides = [1, 1]} : vector<8x4xf32> to vector<8x1xf32>
    %26 = vector.extract_strided_slice %3 {offsets = [3, 0], sizes = [1, 128], strides = [1, 1]} : vector<4x128xf32> to vector<1x128xf32>
    %27 = vector.broadcast %25 : vector<8x1xf32> to vector<8x128xf32>
    %28 = vector.broadcast %26 : vector<1x128xf32> to vector<8x128xf32>
    %29 = arith.mulf %27, %28 : vector<8x128xf32>
    %30 = arith.addf %24, %29 : vector<8x128xf32>
    %c0_7 = arith.constant 0 : index
    %c0_8 = arith.constant 0 : index
    %31 = vector.load %arg1[%c0_7, %c0_8] : memref<8x128xbf16, #tpu.memory_space<vmem>>, vector<8x128xbf16>
    %c0_9 = arith.constant 0 : index
    %c0_10 = arith.constant 0 : index
    %32 = vector.load %arg3[%c0_9, %c0_10] : memref<128x128xbf16, #tpu.memory_space<vmem>>, vector<128x128xbf16>
    %cst = arith.constant dense<0.000000e+00> : vector<8x128xf32>
    %33 = tpu.matmul %31, %32, %cst {dimension_numbers = #tpu.dot_dimension_numbers<[1], [0], [0], [1], [0, 0, 1, 1], [], []>} : vector<8x128xbf16>, vector<128x128xbf16>, vector<8x128xf32> -> vector<8x128xf32>
    %34 = vector.extract_strided_slice %0 {offsets = [0, 0], sizes = [1, 128], strides = [1, 1]} : vector<3x128xf32> to vector<1x128xf32>
    %35 = vector.broadcast %34 : vector<1x128xf32> to vector<8x128xf32>
    %36 = arith.addf %33, %35 : vector<8x128xf32>
    %37 = vector.extract_strided_slice %0 {offsets = [1, 0], sizes = [1, 128], strides = [1, 1]} : vector<3x128xf32> to vector<1x128xf32>
    %38 = vector.extract_strided_slice %0 {offsets = [2, 0], sizes = [1, 128], strides = [1, 1]} : vector<3x128xf32> to vector<1x128xf32>
    %cst_11 = arith.constant dense<0.000000e+00> : vector<8xf32>
    %39 = vector.multi_reduction <add>, %36, %cst_11 [1] : vector<8x128xf32> to vector<8xf32>
    %40 = vector.shape_cast %39 : vector<8xf32> to vector<8x1xf32>
    %cst_12 = arith.constant 1.562500e-02 : f32
    %41 = vector.broadcast %cst_12 : f32 to vector<8x1xf32>
    %42 = arith.mulf %40, %41 : vector<8x1xf32>
    %43 = arith.mulf %36, %36 : vector<8x128xf32>
    %cst_13 = arith.constant dense<0.000000e+00> : vector<8xf32>
    %44 = vector.multi_reduction <add>, %43, %cst_13 [1] : vector<8x128xf32> to vector<8xf32>
    %45 = vector.shape_cast %44 : vector<8xf32> to vector<8x1xf32>
    %cst_14 = arith.constant 1.562500e-02 : f32
    %46 = vector.broadcast %cst_14 : f32 to vector<8x1xf32>
    %47 = arith.mulf %45, %46 : vector<8x1xf32>
    %48 = arith.mulf %42, %42 : vector<8x1xf32>
    %49 = arith.subf %47, %48 : vector<8x1xf32>
    %cst_15 = arith.constant 0.000000e+00 : f32
    %50 = vector.broadcast %cst_15 : f32 to vector<8x1xf32>
    %51 = arith.maximumf %49, %50 : vector<8x1xf32>
    %52 = vector.broadcast %42 : vector<8x1xf32> to vector<8x128xf32>
    %53 = arith.subf %36, %52 : vector<8x128xf32>
    %cst_16 = arith.constant 9.99999974E-6 : f32
    %54 = vector.broadcast %cst_16 : f32 to vector<8x1xf32>
    %55 = arith.addf %51, %54 : vector<8x1xf32>
    %56 = math.rsqrt %55 : vector<8x1xf32>
    %57 = vector.broadcast %56 : vector<8x1xf32> to vector<8x128xf32>
    %58 = arith.mulf %53, %57 : vector<8x128xf32>
    %59 = vector.broadcast %37 : vector<1x128xf32> to vector<8x128xf32>
    %60 = arith.mulf %58, %59 : vector<8x128xf32>
    %61 = vector.broadcast %38 : vector<1x128xf32> to vector<8x128xf32>
    %62 = arith.addf %60, %61 : vector<8x128xf32>
    %cst_17 = arith.constant 0.000000e+00 : f32
    %63 = vector.broadcast %cst_17 : f32 to vector<8x128xf32>
    %64 = arith.maximumf %62, %63 : vector<8x128xf32>
    %65 = arith.truncf %64 : vector<8x128xf32> to vector<8x128xbf16>
    %c0_18 = arith.constant 0 : index
    %c0_19 = arith.constant 0 : index
    %66 = vector.load %arg4[%c0_18, %c0_19] : memref<128x128xbf16, #tpu.memory_space<vmem>>, vector<128x128xbf16>
    %cst_20 = arith.constant dense<0.000000e+00> : vector<8x128xf32>
    %67 = tpu.matmul %65, %66, %cst_20 {dimension_numbers = #tpu.dot_dimension_numbers<[1], [0], [0], [1], [0, 0, 1, 1], [], []>} : vector<8x128xbf16>, vector<128x128xbf16>, vector<8x128xf32> -> vector<8x128xf32>
    %68 = vector.extract_strided_slice %1 {offsets = [0, 0], sizes = [1, 128], strides = [1, 1]} : vector<4x128xf32> to vector<1x128xf32>
    %69 = vector.broadcast %68 : vector<1x128xf32> to vector<8x128xf32>
    %70 = arith.addf %67, %69 : vector<8x128xf32>
    %71 = vector.extract_strided_slice %1 {offsets = [1, 0], sizes = [1, 128], strides = [1, 1]} : vector<4x128xf32> to vector<1x128xf32>
    %72 = vector.extract_strided_slice %1 {offsets = [2, 0], sizes = [1, 128], strides = [1, 1]} : vector<4x128xf32> to vector<1x128xf32>
    %cst_21 = arith.constant dense<0.000000e+00> : vector<8xf32>
    %73 = vector.multi_reduction <add>, %70, %cst_21 [1] : vector<8x128xf32> to vector<8xf32>
    %74 = vector.shape_cast %73 : vector<8xf32> to vector<8x1xf32>
    %cst_22 = arith.constant 3.125000e-02 : f32
    %75 = vector.broadcast %cst_22 : f32 to vector<8x1xf32>
    %76 = arith.mulf %74, %75 : vector<8x1xf32>
    %77 = arith.mulf %70, %70 : vector<8x128xf32>
    %cst_23 = arith.constant dense<0.000000e+00> : vector<8xf32>
    %78 = vector.multi_reduction <add>, %77, %cst_23 [1] : vector<8x128xf32> to vector<8xf32>
    %79 = vector.shape_cast %78 : vector<8xf32> to vector<8x1xf32>
    %cst_24 = arith.constant 3.125000e-02 : f32
    %80 = vector.broadcast %cst_24 : f32 to vector<8x1xf32>
    %81 = arith.mulf %79, %80 : vector<8x1xf32>
    %82 = arith.mulf %76, %76 : vector<8x1xf32>
    %83 = arith.subf %81, %82 : vector<8x1xf32>
    %cst_25 = arith.constant 0.000000e+00 : f32
    %84 = vector.broadcast %cst_25 : f32 to vector<8x1xf32>
    %85 = arith.maximumf %83, %84 : vector<8x1xf32>
    %86 = vector.broadcast %76 : vector<8x1xf32> to vector<8x128xf32>
    %87 = arith.subf %70, %86 : vector<8x128xf32>
    %cst_26 = arith.constant 9.99999974E-6 : f32
    %88 = vector.broadcast %cst_26 : f32 to vector<8x1xf32>
    %89 = arith.addf %85, %88 : vector<8x1xf32>
    %90 = math.rsqrt %89 : vector<8x1xf32>
    %91 = vector.broadcast %90 : vector<8x1xf32> to vector<8x128xf32>
    %92 = arith.mulf %87, %91 : vector<8x128xf32>
    %93 = vector.broadcast %71 : vector<1x128xf32> to vector<8x128xf32>
    %94 = arith.mulf %92, %93 : vector<8x128xf32>
    %95 = vector.broadcast %72 : vector<1x128xf32> to vector<8x128xf32>
    %96 = arith.addf %94, %95 : vector<8x128xf32>
    %cst_27 = arith.constant 0.000000e+00 : f32
    %97 = vector.broadcast %cst_27 : f32 to vector<8x128xf32>
    %98 = arith.maximumf %96, %97 : vector<8x128xf32>
    %99 = arith.addf %98, %30 : vector<8x128xf32>
    %cst_28 = arith.constant 0.000000e+00 : f32
    %100 = vector.broadcast %cst_28 : f32 to vector<8x128xf32>
    %101 = arith.maximumf %99, %100 : vector<8x128xf32>
    %c0_29 = arith.constant 0 : index
    %c0_30 = arith.constant 0 : index
    %102 = vector.load %arg8[%c0_29, %c0_30] : memref<8x128xf32, #tpu.memory_space<vmem>>, vector<8x128xf32>
    tpu.vector_store %arg8[%c0_29, %c0_30], %101 {strides = array<i32>} : memref<8x128xf32, #tpu.memory_space<vmem>>, vector<8x128xf32>,
    return
  }
  func.func @transform_0(%arg0: i32) -> (i32, i32) {
    %c0_i32 = arith.constant 0 : i32
    %c0_i32_0 = arith.constant 0 : i32
    return %arg0, %c0_i32 : i32, i32
  }
  func.func @transform_1(%arg0: i32) -> (i32, i32) {
    %c0_i32 = arith.constant 0 : i32
    %c0_i32_0 = arith.constant 0 : i32
    return %arg0, %c0_i32 : i32, i32
  }
  func.func @transform_2(%arg0: i32) -> (i32, i32) {
    %c0_i32 = arith.constant 0 : i32
    %c0_i32_0 = arith.constant 0 : i32
    %c0_i32_1 = arith.constant 0 : i32
    return %c0_i32, %c0_i32_0 : i32, i32
  }
  func.func @transform_3(%arg0: i32) -> (i32, i32) {
    %c0_i32 = arith.constant 0 : i32
    %c0_i32_0 = arith.constant 0 : i32
    %c0_i32_1 = arith.constant 0 : i32
    return %c0_i32, %c0_i32_0 : i32, i32
  }
  func.func @transform_4(%arg0: i32) -> (i32, i32) {
    %c0_i32 = arith.constant 0 : i32
    %c0_i32_0 = arith.constant 0 : i32
    %c0_i32_1 = arith.constant 0 : i32
    return %c0_i32, %c0_i32_0 : i32, i32
  }
  func.func @transform_5(%arg0: i32) -> (i32, i32) {
    %c0_i32 = arith.constant 0 : i32
    %c0_i32_0 = arith.constant 0 : i32
    %c0_i32_1 = arith.constant 0 : i32
    return %c0_i32, %c0_i32_0 : i32, i32
  }
  func.func @transform_6(%arg0: i32) -> (i32, i32) {
    %c0_i32 = arith.constant 0 : i32
    %c0_i32_0 = arith.constant 0 : i32
    %c0_i32_1 = arith.constant 0 : i32
    return %c0_i32, %c0_i32_0 : i32, i32
  }
  func.func @transform_7(%arg0: i32) -> (i32, i32) {
    %c0_i32 = arith.constant 0 : i32
    %c0_i32_0 = arith.constant 0 : i32
    return %arg0, %c0_i32 : i32, i32
  }
}

</mosaic_0001>

<bundles_post_ra>
// kernel: tpu_custom_call.1
= control target key start
LH: loop header
LB: loop body
LE: loop exit
PB: predicated region body
PF: predicated region fallthrough
CT: control target
= control target key end

     0   :  { %12 = vsyncpa [#allocation3], 0  ;;  %s577_s0 = inlined_call_operand.vmem [shape: bf16[8,128], index: 0, kind: input, shape index: {}]   ;;  %s578_s1 = inlined_call_operand.vmem [shape: f32[8,4], index: 1, kind: input, shape index: {}]   ;;  %s579_s2 = inlined_call_operand.hbm [shape: bf16[128,128], index: 2, kind: input, shape index: {}]   ;;  %s580_s3 = inlined_call_operand.hbm [shape: bf16[128,128], index: 3, kind: input, shape index: {}]   ;;  %s581_s4 = inlined_call_operand.vmem [shape: f32[4,128], index: 4, kind: input, shape index: {}]   ;;  %s582_s5 = inlined_call_operand.vmem [shape: f32[3,128], index: 5, kind: input, shape index: {}]   ;;  %s583_s6 = inlined_call_operand.vmem [shape: f32[4,128], index: 6, kind: input, shape index: {}]   ;;  %s584_s7 = inlined_call_operand.hbm [shape: f32[8,128], index: 7, kind: output, shape index: {}]  }
   0x1   :  { %13 = vsyncpa [#allocation6], 0 }
   0x2   :  { %14 = vsyncpa [#allocation4], 0  ;;  %s23_s26 = sshll.u32 %s579_s2, 4  ;;  %s504_s27 = smov [#allocation2]   ;;  %s24_s26 = int_to_ptr.hbm [resolvable:$true] %s23_s26 }
   0x3   :  { %s25_s28 = sshll.u32 %s504_s27, 4  ;;  %s36_s8 = sshll.u32 %s580_s3, 4  ;;  %s26_s28 = int_to_ptr.vmem [resolvable:$true] %s25_s28  ;;  %s37_s8 = int_to_ptr.hbm [resolvable:$true] %s36_s8 }
   0x4   :  { %s505_s9 = smov 64   ;;  %s506_s10 = smov 4  }
   0x5   :  { %31 = dma.hbm_to_vmem [thread:$0]  %s24_s26, 1024, %s26_s28, [#allocation3], %s505_s9, %s505_s9, %s506_s10  }
   0x6   :  { %s507_s11 = smov [#allocation5]  }
   0x7   :  { %s38_s12 = sshll.u32 %s507_s11, 4  ;;  %s39_s12 = int_to_ptr.vmem [resolvable:$true] %s38_s12 }
   0x8   :  { %44 = dma.hbm_to_vmem [thread:$0]  %s37_s8, 1024, %s39_s12, [#allocation6], %s505_s9, %s505_s9, %s506_s10  }
   0x9   :  { %498 = dma.done.wait [#allocation3], 1024  }
   0xa   :  { %499 = vsyncadd [#allocation3], 4294966272 }
   0xb   :  { %500 = dma.done.wait [#allocation6], 1024  }
   0xc   :  { %501 = vsyncadd [#allocation6], 4294966272  ;;  %v399_v0 = vld [vmem:[#allocation2 + $0x38] sm:$0xff]  ;;  %v398_v1 = vld [vmem:[#allocation2 + $0x30] sm:$0xff]  ;;  %v508_v47 = vmov 2   ;;  %v509_v48 = vmov 3  }
   0xd   :  { %159 = vmatpush.bf16.msra.mxu0 %v399_v0  ;;  %v397_v2 = vld [vmem:[#allocation2 + $0x28] sm:$0xff]  ;;  %v396_v3 = vld [vmem:[#allocation2 + $0x20] sm:$0xff]  ;;  %v395_v4 = vld [vmem:[#allocation2 + $0x18] sm:$0xff]  ;;  %419 = vset.pattern.permute.xlu0 %v508_v47  ;;  %v510_v53 = vmov 0   ;;  %v511_v56 = vmov 1   ;;  %s317_s20 = sshll.u32 %s584_s7, 4  ;;  %s318_s20 = int_to_ptr.hbm [resolvable:$true] %s317_s20 }
   0xe   :  { %v394_v5 = vld [vmem:[#allocation2 + $0x10] sm:$0xff]  ;;  %v393_v6 = vld [vmem:[#allocation2 + $0x8] sm:$0xff]  ;;  %v392_v7 = vld [vmem:[#allocation2] sm:$0xff]  ;;  %420 = vset.pattern.permute.xlu1 %v509_v48  ;;  %417 = vset.pattern.permute.xlu2 %v510_v53 }
   0xf   :  { %v93_v8 = vld [vmem:[%s577_s0] sm:$0xf]  ;;  %v407_v15 = vld [vmem:[#allocation5 + $0x38] sm:$0xff]  ;;  %v406_v16 = vld [vmem:[#allocation5 + $0x30] sm:$0xff] }
  0x10   :  { %v59_v9 = vld [vmem:[%s582_s5] sm:$0x7]  ;;  %266 = vmatpush.bf16.msra.mxu1 %v407_v15  ;;  %v405_v17 = vld [vmem:[#allocation5 + $0x28] sm:$0xff]  ;;  %v403_v19 = vld [vmem:[#allocation5 + $0x18] sm:$0xff] }
  0x11   :  { %160 = vmatpush.bf16.msra.mxu0 %v398_v1  ;;  %v110_v10 = vperm.slane %v59_v9, 0  ;;  %v404_v18 = vld [vmem:[#allocation5 + $0x20] sm:$0xff]  ;;  %v402_v20 = vld [vmem:[#allocation5 + $0x10] sm:$0xff]  ;;  %v401_v22 = vld [vmem:[#allocation5 + $0x8] sm:$0xff]  ;;  %v195_v38 = vperm.slane %v59_v9, 1  ;;  %v197_v41 = vperm.slane %v59_v9, 2 }
  0x12   :  { %v400_v24 = vld [vmem:[#allocation5] sm:$0xff] }
  0x13   :  { %v61_v46 = vld [vmem:[%s578_s1] sm:$0xff] }
  0x14   :  { %267 = vmatpush.bf16.msra.mxu1 %v406_v16  ;;  %v60_v49 = vld [vmem:[%s583_s6] sm:$0xf]  ;;  %66 = vperm.xlu2 %417, %v61_v46  }
  0x15   :  { %161 = vmatpush.bf16.msra.mxu0 %v397_v2  ;;  %v217_v50 = vperm.slane %v60_v49, 0  ;;  %v62_v2 = vld [vmem:[%s581_s4] sm:$0xf]  ;;  %s512_s4 = smov [#allocation7]  }
  0x16   :  { %s315_s17 = sshll.u32 %s512_s4, 4  ;;  %s316_s17 = int_to_ptr.vmem [resolvable:$true] %s315_s17 }
  0x18   :  { %268 = vmatpush.bf16.msra.mxu1 %v405_v17  ;;  %v302_v17 = vperm.slane %v60_v49, 1 }
  0x19   :  { %162 = vmatpush.bf16.msra.mxu0 %v396_v3  ;;  %v69_v3 = vperm.slane %v62_v2, 0 }
  0x1c   :  { %269 = vmatpush.bf16.msra.mxu1 %v404_v18  ;;  %418 = vset.pattern.permute.xlu2 %v511_v56 }
  0x1d   :  { %163 = vmatpush.bf16.msra.mxu0 %v395_v4  ;;  %73 = vperm.xlu2 %418, %v61_v46  }
  0x20   :  { %270 = vmatpush.bf16.msra.mxu1 %v403_v19 }
  0x21   :  { %164 = vmatpush.bf16.msra.mxu0 %v394_v5 }
  0x24   :  { %271 = vmatpush.bf16.msra.mxu1 %v402_v20 }
  0x25   :  { %165 = vmatpush.bf16.msra.mxu0 %v393_v6  ;;  %v63_v6 = vperm.slane %v60_v49, 3 }
  0x28   :  { %272 = vmatpush.bf16.msra.mxu1 %v401_v22  ;;  %v90_v22 = vperm.slane %v62_v2, 3 }
  0x29   :  { %166 = vmatpush.bf16.msra.mxu0 %v392_v7 }
  0x2c   :  { %167 = vmatmul.bf16.vlgmr.msra.gmra.mxu0 %v93_v8  ;;  %273 = vmatpush.bf16.msra.mxu1 %v400_v24  ;;  %v76_v8 = vperm.slane %v62_v2, 1 }
  0x6e   :  { %v67_v1 = vpop.permute.xlu2 %66 }
  0x6f   :  { %v70_v7 = vmul.f32 %v69_v3, %v67_v1 }
  0xa9   :  { %v168_v11 = vpop.f32.mrf.mxu0 }
  0xaa   :  { %v169_v12 = vadd.f32 %v168_v11, %v110_v10  ;;  %v74_v10 = vpop.permute.xlu2 %73 }
  0xac   :  { %172 = vadd.xlane.f32.xlu0 %v169_v12  ;;  %v175_v14 = vmul.f32 %v169_v12, %v169_v12 }
  0xb1   :  { %v170_v13 = vpop.f32.mrf.mxu0 }
  0xb2   :  { %v77_v13 = vmul.f32 %v76_v8, %v74_v10 }
  0xb4   :  { %176 = vadd.xlane.f32.xlu0 %v175_v14  ;;  %v83_v14 = vperm.slane %v62_v2, 2 }
  0xc8   :  { %80 = vperm.xlu0 %419, %v61_v46  }
  0xd0   :  { %421 = vset.pattern.permute.xlu0 %v509_v48 }
 0x11f   :  { %v173_v21 = vpop.xlane.xlu0 %172 }
 0x120   :  { %v174_v23 = vmul.f32 0.015625, %v173_v21 }
 0x122   :  { %v179_v26 = vmul.f32 %v174_v23, %v174_v23  ;;  %v182_v37 = vsub.f32 %v169_v12, %v174_v23  ;;  %v71_v12 = vadd.f32 %v70_v7, %v63_v6 }
 0x124   :  { %v78_v20 = vadd.f32 %v77_v13, %v71_v12 }
 0x127   :  { %v177_v25 = vpop.xlane.xlu0 %176 }
 0x128   :  { %v178_v27 = vmul.f32 0.015625, %v177_v25 }
 0x12a   :  { %v180_v28 = vsub.f32 %v178_v27, %v179_v26  ;;  %v304_v26 = vperm.slane %v60_v49, 2 }
 0x12c   :  { %v181_v29 = vmax.f32 %v180_v28, 0.0 }
 0x12e   :  { %v183_v30 = vadd.f32 1e-05, %v181_v29 }
 0x130   :  { %422 = vrsqrt.f32 %v183_v30  ;;  %vm190_vm1 = vweird.f32 %v183_v30 }
 0x136   :  { %v423_v31 = vpop.eup %422 }
 0x137   :  { %v185_v32 = vmul.f32 %v423_v31, %v183_v30  ;;  %vm191_vm0 = vweird.f32 %v423_v31 }
 0x138   :  { %vm192_vm2 = vmor %vm190_vm1, %vm191_vm0 }
 0x139   :  { %v186_v33 = vmul.f32 %v423_v31, %v185_v32 }
 0x13a   :  { %v81_v16 = vpop.permute.xlu0 %80 }
 0x13b   :  { %v187_v34 = vmul.f32 0.5, %v186_v33  ;;  %v84_v21 = vmul.f32 %v83_v14, %v81_v16 }
 0x13d   :  { %v188_v35 = vsub.f32 1.5, %v187_v34  ;;  %v85_v27 = vadd.f32 %v84_v21, %v78_v20 }
 0x13f   :  { %v189_v36 = vmul.f32 %v423_v31, %v188_v35 }
 0x141   :  { %v193_v39 = vsel %vm192_vm2, %v423_v31, %v189_v36 }
 0x142   :  { %v194_v40 = vmul.f32 %v193_v39, %v182_v37 }
 0x144   :  { %v196_v42 = vmul.f32 %v195_v38, %v194_v40 }
 0x146   :  { %v198_v43 = vadd.f32 %v197_v41, %v196_v42 }
 0x148   :  { %v199_v44 = vmax.f32 %v198_v43, 0.0 }
 0x14a   :  { %v200_v45 = vpack.c.bf16 %v199_v44, %v199_v44 }
 0x14c   :  { %274 = vmatmul.bf16.vlgmr.msra.gmra.mxu1 %v200_v45 }
 0x1c9   :  { %v275_v51 = vpop.f32.mrf.mxu1 }
 0x1ca   :  { %v276_v52 = vadd.f32 %v275_v51, %v217_v50 }
 0x1cc   :  { %279 = vadd.xlane.f32.xlu1 %v276_v52  ;;  %v282_v55 = vmul.f32 %v276_v52, %v276_v52 }
 0x1d1   :  { %v277_v54 = vpop.f32.mrf.mxu1 }
 0x1d4   :  { %283 = vadd.xlane.f32.xlu1 %v282_v55 }
 0x1ed   :  { %87 = vperm.xlu1 %420, %v61_v46  }
 0x23f   :  { %v280_v57 = vpop.xlane.xlu1 %279 }
 0x240   :  { %v281_v58 = vmul.f32 0.03125, %v280_v57 }
 0x242   :  { %v286_v60 = vmul.f32 %v281_v58, %v281_v58  ;;  %v289_v19 = vsub.f32 %v276_v52, %v281_v58 }
 0x247   :  { %v284_v59 = vpop.xlane.xlu1 %283 }
 0x248   :  { %v285_v61 = vmul.f32 0.03125, %v284_v59 }
 0x24a   :  { %v287_v62 = vsub.f32 %v285_v61, %v286_v60 }
 0x24c   :  { %v288_v63 = vmax.f32 %v287_v62, 0.0 }
 0x24e   :  { %v290_v0 = vadd.f32 1e-05, %v288_v63 }
 0x250   :  { %424 = vrsqrt.f32 %v290_v0  ;;  %vm297_vm4 = vweird.f32 %v290_v0 }
 0x256   :  { %v425_v4 = vpop.eup %424 }
 0x257   :  { %v292_v5 = vmul.f32 %v425_v4, %v290_v0  ;;  %vm298_vm3 = vweird.f32 %v425_v4 }
 0x258   :  { %vm299_vm5 = vmor %vm297_vm4, %vm298_vm3 }
 0x259   :  { %v293_v9 = vmul.f32 %v425_v4, %v292_v5 }
 0x25b   :  { %v294_v11 = vmul.f32 0.5, %v293_v9 }
 0x25d   :  { %v295_v15 = vsub.f32 1.5, %v294_v11 }
 0x25f   :  { %v296_v18 = vmul.f32 %v425_v4, %v295_v15  ;;  %v88_v24 = vpop.permute.xlu1 %87 }
 0x260   :  { %v91_v29 = vmul.f32 %v90_v22, %v88_v24 }
 0x261   :  { %v300_v23 = vsel %vm299_vm5, %v425_v4, %v296_v18 }
 0x262   :  { %v301_v25 = vmul.f32 %v300_v23, %v289_v19  ;;  %v92_v32 = vadd.f32 %v91_v29, %v85_v27 }
 0x264   :  { %v303_v28 = vmul.f32 %v302_v17, %v301_v25 }
 0x266   :  { %v305_v30 = vadd.f32 %v304_v26, %v303_v28 }
 0x268   :  { %v306_v31 = vmax.f32 %v305_v30, 0.0 }
 0x26a   :  { %v307_v33 = vadd.f32 %v306_v31, %v92_v32 }
 0x26c   :  { %v308_v34 = vmax.f32 %v307_v33, 0.0 }
 0x26e   :  { %309 = vst [vmem:[#allocation7] sm:$0xff] %v308_v34 }
 0x26f   :  { %320 = dma.vmem_to_hbm [thread:$0]  %s316_s17, 128, %s318_s20, [#allocation4]  }
 0x270   :  { %502 = dma.done.wait [#allocation4], 128  }
 0x271   :  { %503 = vsyncadd [#allocation4], 4294967168 }
 0x272   :  { %325 = vsyncpa [#allocation3], 1 }
 0x273   :  { %326 = vsyncpa [#allocation6], 1 }
 0x274   :  { %327 = vsyncpa [#allocation4], 1 }

</bundles_post_ra>
